<compile_context>
chip_gen: v6e
topology: v6e:2x2x1
jax: 0.10.0
libtpu: 0.0.40
codegen_flags: <defaults>
</compile_context>

<pallas_src>
import numpy as np
import jax
import jax.numpy as jnp
from jax.experimental import pallas as pl
from jax.experimental.pallas import tpu as pltpu


def _im2col(x, kernel_size, stride=1, padding=0):
    """JAX equivalent of the reference _im2col (NCHW input)."""
    kh, kw = kernel_size
    xp = jnp.pad(x, ((0, 0), (0, 0), (padding, padding), (padding, padding)))
    b, c, h, w = xp.shape
    oh = (h - kh) // stride + 1
    ow = (w - kw) // stride + 1
    patches = []
    for y in range(kh):
        for xx in range(kw):
            patches.append(
                xp[:, :, y:y + oh * stride:stride, xx:xx + ow * stride:stride])
    # (B, C, KH*KW, OH, OW) -> (B, C*KH*KW, OH*OW)  (matches torch ordering)
    col = jnp.stack(patches, axis=2)
    return col.reshape(b, c * kh * kw, oh * ow), oh, ow


def _choose_n_tile(n):
    """Lane-dense (multiple-of-128) tile for the folded N = B*OH*OW axis.

    Keeps double-buffered col/out tiles small (v7x has only 64 MiB VMEM) and
    gives the "parallel" grid axis >=2 steps when possible so both v7x
    TensorCores get work.  v5e/v6e: still 128-aligned, single-TC no-op.
    """
    n128 = -(-n // 128) * 128
    if n128 <= 256:
        return n128
    tn = min(1024, (n128 // 2 // 128) * 128)
    return max(tn, 128)


def _conv_matmul_kernel(w_ref, col_ref, bias_ref, out_ref):
    # w_ref:    (OC, CKK)   resident across the grid
    # col_ref:  (CKK, TN)   one lane-dense N tile
    # bias_ref: (OC, 1)     resident
    # out_ref:  (OC, TN)
    acc = jnp.dot(w_ref[...], col_ref[...],
                  preferred_element_type=jnp.float32)
    out_ref[...] = (acc + bias_ref[...]).astype(out_ref.dtype)


def conv2d_pallas(x, weight, bias, padding=1, stride=1, compute_dtype=None):
    """x: (B, C, H, W) NCHW; weight: (OC, C, K, K); bias: (OC,)."""
    B, C, H, W = x.shape
    OC, _, KH, KW = weight.shape

    col, OH, OW = _im2col(x, (KH, KW), stride=stride, padding=padding)
    CKK = C * KH * KW
    OHW = OH * OW
    N = B * OHW

    # Fold batch into the matmul N dimension -> single large lane-dense matmul.
    col = jnp.transpose(col, (1, 0, 2)).reshape(CKK, N)      # (CKK, B*OHW)
    w_col = weight.reshape(OC, CKK)                          # (OC, CKK)
    bias_col = bias.reshape(OC, 1)                           # (OC, 1)

    if compute_dtype is not None:                            # e.g. bf16 on v6e/v7x
        col = col.astype(compute_dtype)
        w_col = w_col.astype(compute_dtype)

    # Pad N to a multiple of the lane-dense tile; grid over N tiles.
    tn = _choose_n_tile(N)
    n_pad = -(-N // tn) * tn
    if n_pad != N:
        col = jnp.pad(col, ((0, 0), (0, n_pad - N)))
    n_tiles = n_pad // tn

    out = pl.pallas_call(
        _conv_matmul_kernel,
        out_shape=jax.ShapeDtypeStruct((OC, n_pad), x.dtype),
        grid_spec=pltpu.PrefetchScalarGridSpec(
            num_scalar_prefetch=0,
            grid=(n_tiles,),
            in_specs=[
                pl.BlockSpec((OC, CKK), lambda n: (0, 0)),   # resident weight
                pl.BlockSpec((CKK, tn), lambda n: (0, n)),   # N tile of col
                pl.BlockSpec((OC, 1), lambda n: (0, 0)),     # resident bias
            ],
            out_specs=pl.BlockSpec((OC, tn), lambda n: (0, n)),
        ),
        compiler_params=pltpu.CompilerParams(
            dimension_semantics=("parallel",),
            vmem_limit_bytes=32 * 1024 * 1024,               # safe on v7x's 64 MiB
        ),
    )(w_col, col, bias_col)

    out = out[:, :N]                                         # drop N padding
    out = out.reshape(OC, B, OHW).transpose(1, 0, 2)         # (B, OC, OHW)
    return out.reshape(B, OC, OH, OW)


def pixel_shuffle(x, upscale_factor):
    """PixelShuffle: (B, C*r*r, H, W) -> (B, C, H*r, W*r)."""
    B, C, H, W = x.shape
    r = upscale_factor
    c = C // (r * r)
    x = x.reshape(B, c, r, r, H, W)
    x = jnp.transpose(x, (0, 1, 4, 2, 5, 3))
    return x.reshape(B, c, H * r, W * r)


def upsample_pallas(x, weight, bias, padding=1):
    """Upsample.forward: Conv2d(C -> 4C, k=3, pad=1) then PixelShuffle(2)."""
    out = conv2d_pallas(x, weight, bias, padding=padding)
    # TODO(synk): fuse the PixelShuffle relayout into the conv kernel epilogue
    # to save one HBM round-trip; it is a pure permutation, handled by XLA here.
    return pixel_shuffle(out, 2)


def upsample_reference(x, weight, bias, padding=1):
    """Pure-JAX reference matching the PyTorch Upsample module semantics."""
    dn = jax.lax.conv_dimension_numbers(x.shape, weight.shape,
                                        ("NCHW", "OIHW", "NCHW"))
    out = jax.lax.conv_general_dilated(
        x, weight, window_strides=(1, 1),
        padding=[(padding, padding), (padding, padding)],
        dimension_numbers=dn)
    out = out + bias.reshape(1, -1, 1, 1)
    return pixel_shuffle(out, 2)


if __name__ == "__main__":
    # Upsample(num_channel=4): Conv2d(4 -> 16, k=3, pad=1) + PixelShuffle(2).
    num_channel = 4
    in_channels = num_channel
    out_channels = num_channel * 4
    kernel_size = 3
    padding = 1

    B, H, W = 2, 16, 16

    key = jax.random.PRNGKey(0)
    kx, kw, kb = jax.random.split(key, 3)

    # Deterministic parameter init mirroring uniform_(-sqrt(k), sqrt(k)).
    k = 1.0 / (in_channels * np.power(kernel_size, 2))
    bound = float(np.sqrt(k))
    weight = jax.random.uniform(
        kw, (out_channels, in_channels, kernel_size, kernel_size),
        dtype=jnp.float32, minval=-bound, maxval=bound)
    bias = jax.random.uniform(
        kb, (out_channels,), dtype=jnp.float32, minval=-bound, maxval=bound)

    x = jax.random.normal(kx, (B, in_channels, H, W), dtype=jnp.float32)

    out = upsample_pallas(x, weight, bias, padding=padding)
    out = jax.block_until_ready(out)

    ref = upsample_reference(x, weight, bias, padding=padding)
    ref = jax.block_until_ready(ref)

    assert out.shape == (B, num_channel, 2 * H, 2 * W), out.shape
    np.testing.assert_allclose(np.asarray(out), np.asarray(ref),
                               rtol=1e-5, atol=1e-5)
    print("KERNEL_OK")
</pallas_src>

<mosaic_0001>
module attributes {stable_mosaic.version = 11 : i64} {
  func.func @_conv_matmul_kernel(%arg0: i32, %arg1: memref<16x36xf32, #tpu.memory_space<vmem>>, %arg2: memref<36x256xf32, #tpu.memory_space<vmem>>, %arg3: memref<16x1xf32, #tpu.memory_space<vmem>>, %arg4: memref<16x256xf32, #tpu.memory_space<vmem>>) attributes {dimension_semantics = [#tpu.dimension_semantics<parallel>], iteration_bounds = array<i64: 2>, scalar_prefetch = 0 : i64, scratch_operands = 0 : i64, tpu.core_type = #tpu.core_type<tc>, window_params = [{pipeline_mode = #tpu.pipeline_mode<synchronous>, transform_indices = @transform_0, window_bounds = array<i64: 16, 36>}, {transform_indices = @transform_1, window_bounds = array<i64: 36, 256>}, {pipeline_mode = #tpu.pipeline_mode<synchronous>, transform_indices = @transform_2, window_bounds = array<i64: 16, 1>}, {transform_indices = @transform_3, window_bounds = array<i64: 16, 256>}]} {
    %c0 = arith.constant 0 : index
    %c0_0 = arith.constant 0 : index
    %0 = vector.load %arg1[%c0, %c0_0] : memref<16x36xf32, #tpu.memory_space<vmem>>, vector<16x36xf32>
    %c0_1 = arith.constant 0 : index
    %c0_2 = arith.constant 0 : index
    %1 = vector.load %arg2[%c0_1, %c0_2] : memref<36x256xf32, #tpu.memory_space<vmem>>, vector<36x256xf32>
    %cst = arith.constant dense<0.000000e+00> : vector<16x256xf32>
    %2 = tpu.matmul %0, %1, %cst {dimension_numbers = #tpu.dot_dimension_numbers<[1], [0], [0], [1], [0, 0, 1, 1], [], []>} : vector<16x36xf32>, vector<36x256xf32>, vector<16x256xf32> -> vector<16x256xf32>
    %c0_3 = arith.constant 0 : index
    %c0_4 = arith.constant 0 : index
    %3 = vector.load %arg3[%c0_3, %c0_4] : memref<16x1xf32, #tpu.memory_space<vmem>>, vector<16x1xf32>
    %4 = vector.broadcast %3 : vector<16x1xf32> to vector<16x256xf32>
    %5 = arith.addf %2, %4 : vector<16x256xf32>
    %c0_5 = arith.constant 0 : index
    %c0_6 = arith.constant 0 : index
    %6 = vector.load %arg4[%c0_5, %c0_6] : memref<16x256xf32, #tpu.memory_space<vmem>>, vector<16x256xf32>
    tpu.vector_store %arg4[%c0_5, %c0_6], %5 {strides = array<i32>} : memref<16x256xf32, #tpu.memory_space<vmem>>, vector<16x256xf32>,
    return
  }
  func.func @transform_0(%arg0: i32) -> (i32, i32) {
    %c0_i32 = arith.constant 0 : i32
    %c0_i32_0 = arith.constant 0 : i32
    %c0_i32_1 = arith.constant 0 : i32
    return %c0_i32, %c0_i32_0 : i32, i32
  }
  func.func @transform_1(%arg0: i32) -> (i32, i32) {
    %c0_i32 = arith.constant 0 : i32
    %c0_i32_0 = arith.constant 0 : i32
    return %c0_i32, %arg0 : i32, i32
  }
  func.func @transform_2(%arg0: i32) -> (i32, i32) {
    %c0_i32 = arith.constant 0 : i32
    %c0_i32_0 = arith.constant 0 : i32
    %c0_i32_1 = arith.constant 0 : i32
    return %c0_i32, %c0_i32_0 : i32, i32
  }
  func.func @transform_3(%arg0: i32) -> (i32, i32) {
    %c0_i32 = arith.constant 0 : i32
    %c0_i32_0 = arith.constant 0 : i32
    return %c0_i32, %arg0 : i32, i32
  }
}

</mosaic_0001>

<bundles_post_ra>
// kernel: tpu_custom_call.1
= control target key start
LH: loop header
LB: loop body
LE: loop exit
PB: predicated region body
PF: predicated region fallthrough
CT: control target
= control target key end

     0   :  { %8 = vsyncpa [#allocation3], 0  ;;  %s781_s0 = inlined_call_operand.vmem [shape: f32[16,36], index: 0, kind: input, shape index: {}]   ;;  %s782_s1 = inlined_call_operand.hbm [shape: f32[36,512], index: 1, kind: input, shape index: {}]   ;;  %s783_s2 = inlined_call_operand.vmem [shape: f32[16,1], index: 2, kind: input, shape index: {}]   ;;  %s784_s3 = inlined_call_operand.hbm [shape: f32[16,512], index: 3, kind: output, shape index: {}]  }
   0x1   :  { %10 = vsyncpa [#allocation3 + $0x1], 0 }
   0x2   :  { %11 = vsyncpa [#allocation4], 0 }
   0x3   :  { %13 = vsyncpa [#allocation4 + $0x1], 0  ;;  %s606_s12 = smov 0   ;;  %s608_s13 = smov 0  }
   0x4   :  { %s610_s14 = smov 0   ;;  %s612_s15 = smov 0  }
   0x5 LB: > { %s627_s16 = sadd.s32 4294967295, %s574_s15   ;;  %s397_s17 = sadd.s32 4294967294, %s574_s15   ;;  %s574_s15 = sphi %s612_s15, %s799_s15   ;;  %s570_s14 = sphi %s610_s14, %s798_s14   ;;  %s566_s13 = sphi %s608_s13, %s797_s13   ;;  %s562_s12 = sphi %s606_s12, %s796_s12  }
   0x6   : > { %s631_s18 = sadd.s32 1, %s574_s15   ;;  %s47_s19 = sadd.s32 1, %s570_s14 }
   0x7   : > { %s44_s20 = ssub.s32 %s574_s15, %s631_s18  ;;  %p54_p0 = scmp.ne.s32.totalorder %s570_s14, %s566_s13 }
   0x8   : > { %p45_p1 = scmp.eq.s32.totalorder %s44_s20, 0  ;;  %p55_p2 = scmp.eq.s32.totalorder %s574_s15, 0 }
   0x9   : > { %p60_p3 = scmp.ne.s32.totalorder %s566_s13, %s562_s12  ;;  %p61_p4 = scmp.eq.s32.totalorder %s627_s16, 0 }
   0xa   : > { %s643_s21 = scalar_select %p45_p1, %s570_s14, %s47_s19  }
   0xb   : > { %p56_p5 = por %p55_p2, %p54_p0  ;;  %p645_p6 = por %p61_p4, %p60_p3 }
   0xc   : > { %p105_p7 = scmp.eq.s32.totalorder %s627_s16, 1  ;;  %p111_p8 = scmp.eq.s32.totalorder %s397_s17, 1 }
   0xd   : > { %s787_s22 = scalar_select %p645_p6, 1, 0 }
   0xe   : > { %p439_p10 = scmp.lt.s32.totalorder %s574_s15, 2  ;;  %p652_p11 = por %p105_p7, %p54_p0 }
   0xf   : > { %p656_p12 = por %p111_p8, %p60_p3  ;;  %s137_s25 = sand.u32 1, %s570_s14  }
  0x10   : > { %s788_s23 = scalar_select %p652_p11, 1, 0 }
  0x11   : > { %s789_s24 = scalar_select %p656_p12, 1, 0 }
  0x12   : > { %s413_s26 = sshll.u32 %s574_s15, 8  ;;  %s425_s27 = smul.u32 80, %s137_s25 }
  0x13   : > { %s665_s30 = scalar_lea.hbm %s782_s1, %s413_s26  ;;  %p667_p13 = pnand %p439_p10, %p56_p5 }
  0x14   : > { %s141_s5 = scalar_lea.vmem [#allocation2], %s425_s27  ;;  %s674_s7 = scalar_lea.sflag [#allocation3], %s137_s25 }
  0x15   : > { %s148_s6 = sshll.u32 %s141_s5, 4  ;;  %s482_s8 = scalar_lea.hbm %s665_s30, 1280  ;;  %s671_s6 = int_to_ptr.vmem [resolvable:$true] %s148_s6 }
  0x16   : > { %p483_p1 = scmp.ne.s32.totalorder %s665_s30, %s482_s8  ;;  %p484_p2 = pneg %p667_p13 }
  0x17   : > { %s487_s11 = scalar_lea.hbm %s782_s1, 2560  ;;  %p488_p5 = scmp.lt.s32.totalorder %s665_s30, %s782_s1 }
  0x18   : > { %p485_p3 = pnand %p484_p2, %p483_p1  ;;  %p489_p7 = scmp.lt.s32.totalorder %s487_s11, %s482_s8 }
  0x1a   : > { %p486_p4 = pneg %p485_p3  ;;  %p490_p8 = por %p489_p7, %p488_p5 }
  0x1c   : > { %p491_p10 = pnand %p490_p8, %p486_p4 }
  0x1e   : > { %494 = shalt.err (!%p491_p10)
}
  0x1f   : > { %s495_s20 = scalar_lea.vmem %s671_s6, 1280  ;;  %s576_s25 = smov [#allocation2]  }
  0x20   : > { %p496_p9 = scmp.ne.s32.totalorder %s671_s6, %s495_s20  ;;  %s500_s26 = sshll.u32 %s576_s25, 4  ;;  %s501_s26 = int_to_ptr.vmem [resolvable:$false] %s500_s26 }
  0x21   : > { %s502_s27 = scalar_lea.vmem %s501_s26, 2560  ;;  %p503_p3 = scmp.lt.s32.totalorder %s671_s6, %s501_s26 }
  0x22   : > { %p498_p0 = pnand %p496_p9, %p484_p2  ;;  %p504_p12 = scmp.lt.s32.totalorder %s502_s27, %s495_s20 }
  0x24   : > { %p499_p1 = pneg %p498_p0  ;;  %p505_p11 = por %p504_p12, %p503_p3 }
  0x26   : > { %p506_p6 = pnand %p505_p11, %p499_p1 }
  0x28   : > { %509 = shalt.err (!%p506_p6)
}
  0x29   : > { %s577_s28 = smov 512   ;;  %s578_s29 = smov 256  }
  0x2a   : > { %s579_s5 = smov 16   ;;  %p156_p9 = scmp.lt.s32.totalorder %s574_s15, 3 }
  0x2b   : > { %434 = dma.hbm_to_vmem [thread:$0]  (!%p667_p13), %s665_s30, 1280, %s671_s6, %s674_s7, %s577_s28, %s578_s29, %s579_s5  }
  0x2c   : > { %p791_p0 = scmp.ge.s32.totalorder %s574_s15, 1 }
  0x2e   : > { %p157_p2 = pnand %p791_p0, %p156_p9 }
  0x2f   : > { %s699_s8 = sand.u32 (!%p157_p2), 1, %s566_s13   ;;  %p792_p6 = scmp.ne.s32.totalorder (!%p157_p2), %s787_s22, 0 }
  0x30   : > { %160 = sbr.rel (%p157_p2) target bundleno = 279 (0x117), region = 32  ;;  %s163_s10 = scalar_lea.sflag (!%p157_p2), [#allocation3], %s699_s8 }
  0x31   : > { %s426_s9 = smul.u32 (!%p157_p2), 80, %s699_s8 }
  0x33   : > { %s703_s11 = scalar_lea.vmem (!%p157_p2), [#allocation2], %s426_s9 }
  0x35   : > { %553 = dma.done.wait (%p792_p6), %s163_s10, 1280  }
  0x36   : > { %555 = vsyncadd (%p792_p6), %s163_s10, 4294966016  ;;  %v580_v0 = vmov 0.0   ;;  %v581_v1 = vmov 0   ;;  %vm222_vm0 = vcmask 1043456   ;;  %v202_v2 = vld [vmem:[%s703_s11 + $0x48] sm:$0xf] }
  0x37   : > { %293 = vmatprep.mubr.f32.mxu0 %v580_v0  ;;  %299 = vmatprep.mubr.f32.mxu1 %v580_v0  ;;  %v201_v3 = vld [vmem:[%s703_s11 + $0x40] sm:$0xf]  ;;  %v200_v4 = vld [vmem:[%s703_s11 + $0x38] sm:$0xff]  ;;  %v199_v5 = vld [vmem:[%s703_s11 + $0x30] sm:$0xff]  ;;  %vm215_vm1 = vcmask 293888   ;;  %s403_s25 = sshll.u32 %s699_s8, 5 }
  0x38   : > { %481 = vset.pattern.permute.xlu0 %v581_v1  ;;  %404 = vmatprep.subr.msk.mxu0 %vm222_vm0, %v202_v2  ;;  %v198_v6 = vld [vmem:[%s703_s11 + $0x28] sm:$0xff]  ;;  %v197_v7 = vld [vmem:[%s703_s11 + $0x20] sm:$0xff]  ;;  %v196_v8 = vld [vmem:[%s703_s11 + $0x18] sm:$0xff]  ;;  %s188_s26 = scalar_lea.vmem [#allocation5], %s403_s25  ;;  %s414_s28 = sshll.u32 %s627_s16, 8 }
  0x39   : > { %415 = vmatprep.subr.msk.mxu1 %vm222_vm0, %v202_v2  ;;  %405 = vmatpush1.msk.msra.mxu0 %vm222_vm0, %v201_v3  ;;  %v195_v9 = vld [vmem:[%s703_s11 + $0x10] sm:$0xff]  ;;  %v194_v10 = vld [vmem:[%s703_s11 + $0x8] sm:$0xff]  ;;  %v193_v11 = vld [vmem:[%s703_s11] sm:$0xff]  ;;  %s324_s27 = sshll.u32 %s188_s26, 4  ;;  %s738_s9 = scalar_lea.hbm %s784_s3, %s414_s28  ;;  %s733_s27 = int_to_ptr.vmem [resolvable:$true] %s324_s27 }
  0x3a   : > { %420 = vmatpush1.msk.msra.mxu1 %vm222_vm0, %v201_v3  ;;  %253 = vmatprep.subr.mxu0 %v200_v4  ;;  %v191_v12 = vld [vmem:[%s781_s0] sm:$0xff]  ;;  %v192_v13 = vld [vmem:[%s781_s0 + $0x8] sm:$0xff]  ;;  %s311_s16 = scalar_lea.sflag [#allocation4], %s699_s8  ;;  %s510_s10 = scalar_lea.vmem %s733_s27, 512 }
  0x3b   : > { %416 = vmatprep.subr.mxu1 %v200_v4  ;;  %254 = vmatpush1.msra.mxu0 %v199_v5  ;;  %v203_v14 = vld [vmem:[%s783_s2] sm:$0xff]  ;;  %v204_v15 = vld [vmem:[%s783_s2 + $0x8] sm:$0xff]  ;;  %p511_p11 = scmp.ne.s32.totalorder %s733_s27, %s510_s10  ;;  %p793_p12 = scmp.ne.s32.totalorder %s788_s23, 0 }
  0x3c   : > { %421 = vmatpush1.msra.mxu1 %v199_v5  ;;  %255 = vmatprep.subr.mxu0 %v198_v6  ;;  %s582_s11 = smov [#allocation5]  }
  0x3d   : > { %417 = vmatprep.subr.mxu1 %v198_v6  ;;  %256 = vmatpush1.msra.mxu0 %v197_v7  ;;  %p512_p13 = pnand %p511_p11, %p793_p12  ;;  %s514_s22 = sshll.u32 %s582_s11, 4  ;;  %s515_s22 = int_to_ptr.vmem [resolvable:$false] %s514_s22 }
  0x3e   : > { %422 = vmatpush1.msra.mxu1 %v197_v7  ;;  %257 = vmatprep.subr.mxu0 %v196_v8  ;;  %s516_s30 = scalar_lea.vmem %s515_s22, 1024  ;;  %p517_p5 = scmp.lt.s32.totalorder %s733_s27, %s515_s22 }
  0x3f   : > { %418 = vmatprep.subr.mxu1 %v196_v8  ;;  %258 = vmatpush1.msra.mxu0 %v195_v9  ;;  %p513_p4 = pneg %p512_p13  ;;  %p518_p7 = scmp.lt.s32.totalorder %s516_s30, %s510_s10 }
  0x40   : > { %423 = vmatpush1.msra.mxu1 %v195_v9  ;;  %259 = vmatprep.subr.mxu0 %v194_v10 }
  0x41   : > { %419 = vmatprep.subr.mxu1 %v194_v10  ;;  %260 = vmatpush1.msra.mxu0 %v193_v11  ;;  %p519_p8 = por %p518_p7, %p517_p5 }
  0x42   : > { %424 = vmatpush1.msra.mxu1 %v193_v11  ;;  %406 = vmatmul.mubr.msk.f32.vlgmr.msra.gmra.mxu0 %vm215_vm1, %v191_v12 }
  0x43   : > { %407 = vmatmul.mubr.msk.f32.vlgmr.msra.gmra.mxu1 %vm215_vm1, %v192_v13  ;;  %207 = vperm.xlu0 %481, %v203_v14   ;;  %p520_p10 = pnand %p519_p8, %p513_p4 }
  0x47   : > { %212 = vperm.xlu0 %481, %v204_v15  }
  0xbe   : > { %v208_v16 = vpop.permute.xlu0 %207 }
  0xc2   : > { %v213_v17 = vpop.permute.xlu0 %212 }
 0x102   : > { %v295_v18 = vpop.f32.mrf.mxu0 }
 0x103   : > { %v301_v19 = vpop.f32.mrf.mxu1  ;;  %v296_v20 = vadd.f32 %v295_v18, %v208_v16 }
 0x104   : > { %v302_v21 = vadd.f32 %v301_v19, %v213_v17  ;;  %v297_v22 = vpop.f32.mrf.mxu0 }
 0x105   : > { %v303_v23 = vpop.f32.mrf.mxu1  ;;  %306 = vst [vmem:[%s188_s26] sm:$0xff] %v296_v20  ;;  %v298_v24 = vadd.f32 %v297_v22, %v208_v16 }
 0x106   : > { %308 = vst [vmem:[%s188_s26 + $0x10] sm:$0xff] %v302_v21  ;;  %v304_v25 = vadd.f32 %v303_v23, %v213_v17 }
 0x107   : > { %307 = vst [vmem:[%s188_s26 + $0x8] sm:$0xff] %v298_v24 }
 0x108   : > { %309 = vst [vmem:[%s188_s26 + $0x18] sm:$0xff] %v304_v25 }
 0x109   : > { %523 = shalt.err (!%p520_p10)
}
 0x10a   : > { %s524_s4 = scalar_lea.hbm %s738_s9, 512  ;;  %s528_s17 = scalar_lea.hbm %s784_s3, 1024 }
 0x10b   : > { %p525_p1 = scmp.ne.s32.totalorder %s738_s9, %s524_s4  ;;  %p529_p0 = scmp.lt.s32.totalorder %s738_s9, %s784_s3 }
 0x10c   : > { %p530_p2 = scmp.lt.s32.totalorder %s528_s17, %s524_s4 }
 0x10d   : > { %p526_p3 = pnand %p525_p1, %p793_p12 }
 0x10e   : > { %p531_p6 = por %p530_p2, %p529_p0 }
 0x10f   : > { %p527_p9 = pneg %p526_p3 }
 0x111   : > { %p532_p11 = pnand %p531_p6, %p527_p9 }
 0x113   : > { %535 = shalt.err (!%p532_p11)
}
 0x114   : > { %s583_s25 = smov 256   ;;  %s584_s26 = smov 512  }
 0x115   : > { %s585_s28 = smov 16  }
 0x116   : > { %429 = dma.vmem_to_hbm [thread:$0]  (%p793_p12), %s733_s27, 512, %s738_s9, %s311_s16, %s583_s25, %s584_s26, %s585_s28  }
 0x117 PF: > { %s339_s29 = sand.u32 1, %s562_s12   ;;  %p794_p13 = scmp.ne.s32.totalorder %s789_s24, 0 }
 0x118   : > { %p795_p4 = scmp.ge.s32.totalorder %s574_s15, 2  ;;  %s340_s5 = scalar_lea.sflag [#allocation4], %s339_s29 }
 0x11a   : > { %p436_p5 = pnand %p795_p4, %p794_p13 }
 0x11c   : > { %p437_p7 = pneg %p436_p5 }
 0x11e   : > { %557 = dma.done.wait (%p437_p7), %s340_s5, 512  }
 0x11f   : > { %559 = vsyncadd (%p437_p7), %s340_s5, 4294966784  ;;  %p16_p8 = scmp.ge.s32.totalorder %s631_s18, 4   ;;  %s796_s12 = smov %s566_s13 }
 0x120   : > { %s797_s13 = smov %s570_s14  ;;  %s798_s14 = smov %s643_s21 }
 0x121   : > { %s799_s15 = smov %s631_s18  ;;  %18 = sbr.rel (!%p16_p8) target bundleno = 5 (0x5), region = 77 }
 0x126   :  { %345 = vsyncpa [#allocation3], 1 }
 0x127   :  { %347 = vsyncpa [#allocation3 + $0x1], 1 }
 0x128   :  { %348 = vsyncpa [#allocation4], 1 }
 0x129   :  { %350 = vsyncpa [#allocation4 + $0x1], 1 }

</bundles_post_ra>
